<compile_context>
chip_gen: v7x
topology: tpu7x:2x2x1
jax: 0.10.0
libtpu: 0.0.40
codegen_flags: <defaults>
</compile_context>

<pallas_src>
import functools
import math

import jax
import jax.numpy as jnp
from jax import lax
from jax.experimental import pallas as pl
from jax.experimental.pallas import tpu as pltpu


# ----------------------------- tiled linear (y = x @ W.T + b) -----------------

def _matmul_nt_kernel(x_ref, w_ref, o_ref, acc_ref):
    # x: (tm, tk), w: (tn, tk) [PyTorch (out, in) layout], o: (tm, tn)
    @pl.when(pl.program_id(2) == 0)
    def _init():
        acc_ref[...] = jnp.zeros_like(acc_ref)

    acc_ref[...] += lax.dot_general(
        x_ref[...], w_ref[...],
        dimension_numbers=(((1,), (1,)), ((), ())),   # contract K of both
        preferred_element_type=jnp.float32,
    )

    @pl.when(pl.program_id(2) == pl.num_programs(2) - 1)
    def _fini():
        o_ref[...] = acc_ref[...].astype(o_ref.dtype)


def _matmul_nt_bias_kernel(x_ref, w_ref, b_ref, o_ref, acc_ref):
    @pl.when(pl.program_id(2) == 0)
    def _init():
        acc_ref[...] = jnp.zeros_like(acc_ref)

    acc_ref[...] += lax.dot_general(
        x_ref[...], w_ref[...],
        dimension_numbers=(((1,), (1,)), ((), ())),
        preferred_element_type=jnp.float32,
    )

    @pl.when(pl.program_id(2) == pl.num_programs(2) - 1)
    def _fini():
        o_ref[...] = (acc_ref[...] + b_ref[...].astype(jnp.float32)).astype(o_ref.dtype)


def _round_up(x, m):
    return ((x + m - 1) // m) * m


def _choose_tile(dim, candidates):
    """Return (tile, padded_dim).

    Prefer the largest candidate that evenly divides `dim`.  If none divides:
      * small dims (<= 128) are taken whole (full-dim blocks always satisfy the
        (8,128) rule and are tiny anyway);
      * large dims are padded up to a multiple of 128 so a bounded tile can be
        used instead of one huge full-dim block (keeps VMEM predictable and the
        pipeline alive on all generations, incl. v7x's 64 MiB VMEM).
    """
    for c in candidates:
        if dim % c == 0:
            return c, dim
    if dim <= 128:
        return dim, dim
    padded = _round_up(dim, 128)
    for c in candidates:
        if padded % c == 0:
            return c, padded
    return 128, padded


def _pallas_linear(x2d, w_nk, bias=None):
    """y = x2d @ w_nk.T (+ bias).  x2d: (M, K); w_nk: (N, K) PyTorch Linear layout."""
    M, K = x2d.shape
    N, K2 = w_nk.shape
    assert K == K2

    tm, Mp = _choose_tile(M, (512, 256, 128))
    tn, Np = _choose_tile(N, (512, 256, 128))
    tk, Kp = _choose_tile(K, (512, 256, 128))

    if Mp != M or Kp != K:
        x2d = jnp.pad(x2d, ((0, Mp - M), (0, Kp - K)))
    if Np != N or Kp != K:
        w_nk = jnp.pad(w_nk, ((0, Np - N), (0, Kp - K)))

    grid = (Mp // tm, Np // tn, Kp // tk)

    x_spec = pl.BlockSpec((tm, tk), lambda i, j, k: (i, k))
    w_spec = pl.BlockSpec((tn, tk), lambda i, j, k: (j, k))
    o_spec = pl.BlockSpec((tm, tn), lambda i, j, k: (i, j))
    cost = pl.CostEstimate(
        flops=2 * Mp * Np * Kp,
        transcendentals=0,
        bytes_accessed=4 * (Mp * Kp + Np * Kp + Mp * Np),
    )
    cparams = pltpu.CompilerParams(
        dimension_semantics=("parallel", "parallel", "arbitrary"),
    )
    scratch = [pltpu.VMEM((tm, tn), jnp.float32)]

    if bias is None:
        out = pl.pallas_call(
            _matmul_nt_kernel,
            out_shape=jax.ShapeDtypeStruct((Mp, Np), x2d.dtype),
            grid=grid,
            in_specs=[x_spec, w_spec],
            out_specs=o_spec,
            scratch_shapes=scratch,
            compiler_params=cparams,
            cost_estimate=cost,
        )(x2d, w_nk)
    else:
        b2d = bias.reshape(1, N)
        if Np != N:
            b2d = jnp.pad(b2d, ((0, 0), (0, Np - N)))
        b_spec = pl.BlockSpec((1, tn), lambda i, j, k: (0, j))
        out = pl.pallas_call(
            _matmul_nt_bias_kernel,
            out_shape=jax.ShapeDtypeStruct((Mp, Np), x2d.dtype),
            grid=grid,
            in_specs=[x_spec, w_spec, b_spec],
            out_specs=o_spec,
            scratch_shapes=scratch,
            compiler_params=cparams,
            cost_estimate=cost,
        )(x2d, w_nk, b2d)

    if Mp != M or Np != N:
        out = out[:M, :N]
    return out


# ----------------------------- attention ---------------------------------------

def _attn_kernel(q_ref, k_ref, v_ref, o_ref, p_ref, *, inv_scale):
    # q block: (1, 1, tq, d_k); k/v blocks: (1, 1, S, d_k);
    # o block:  (1, 1, tq, d_k); p block:   (1, 1, tq, S).
    q = q_ref[0, 0]                                   # (tq, d_k), native dtype
    k = k_ref[0, 0]                                   # (S, d_k)
    v = v_ref[0, 0]                                   # (S, d_k)

    # score = Q @ K^T / sqrt(d_k)  (contract last dims; f32 accumulation).
    s = lax.dot_general(
        q, k,
        dimension_numbers=(((1,), (1,)), ((), ())),
        preferred_element_type=jnp.float32,
    ) * inv_scale                                     # (tq, S) f32

    m = jnp.max(s, axis=-1, keepdims=True)
    e = jnp.exp(s - m)
    denom = jnp.sum(e, axis=-1, keepdims=True)
    p = e / denom                                     # exact division (cheap: (tq,1) recips)
    p_ref[0, 0] = p.astype(p_ref.dtype)

    # dropout(p) is identity in eval mode.
    ctx = jnp.dot(p.astype(v.dtype), v, preferred_element_type=jnp.float32)  # (tq, d_k)
    o_ref[0, 0] = ctx.astype(o_ref.dtype)


def _choose_q_tile(S):
    for c in (512, 256, 128):
        if S % c == 0:
            return c, S
    if S <= 512:
        return S, S
    return 128, _round_up(S, 128)


def _pallas_attention(Q, K, V, *, inv_scale):
    """Q/K/V: (B, H, S, d_k) -> (ctx (B, H, S, d_k), attn (B, H, S, S))."""
    B, H, Sq, d_k = Q.shape
    Skv = K.shape[2]

    tq, Sp = _choose_q_tile(Sq)
    if Sp != Sq:
        # Pad only the query axis; softmax always runs over the true key length.
        Q = jnp.pad(Q, ((0, 0), (0, 0), (0, Sp - Sq), (0, 0)))

    grid = (B, H, Sp // tq)
    kernel = functools.partial(_attn_kernel, inv_scale=inv_scale)

    q_spec = pl.BlockSpec((1, 1, tq, d_k), lambda b, h, i: (b, h, i, 0))
    kv_spec = pl.BlockSpec((1, 1, Skv, d_k), lambda b, h, i: (b, h, 0, 0))
    o_spec = pl.BlockSpec((1, 1, tq, d_k), lambda b, h, i: (b, h, i, 0))
    p_spec = pl.BlockSpec((1, 1, tq, Skv), lambda b, h, i: (b, h, i, 0))

    cost = pl.CostEstimate(
        flops=4 * B * H * Sp * Skv * d_k,
        transcendentals=B * H * Sp * Skv,
        bytes_accessed=4 * (B * H * (Sp + 2 * Skv) * d_k
                            + B * H * Sp * d_k
                            + B * H * Sp * Skv),
    )

    ctx, probs = pl.pallas_call(
        kernel,
        out_shape=(
            jax.ShapeDtypeStruct((B, H, Sp, d_k), Q.dtype),
            jax.ShapeDtypeStruct((B, H, Sp, Skv), jnp.float32),
        ),
        grid=grid,
        in_specs=[q_spec, kv_spec, kv_spec],
        out_specs=(o_spec, p_spec),
        compiler_params=pltpu.CompilerParams(
            dimension_semantics=("parallel", "parallel", "parallel"),
        ),
        cost_estimate=cost,
    )(Q, K, V)

    if Sp != Sq:
        ctx = ctx[:, :, :Sq]
        probs = probs[:, :, :Sq]
    return ctx, probs


# ----------------------------- forward ------------------------------------------

def multi_head_attention(query, key, value, params, n_heads):
    """Forward pass of MultiHeadAttention.forward(query, key, value, mask=None).

    query/key/value: (B, S, d_model).  Weights kept in PyTorch (out, in) layout.
    Returns (x (B, S, d_model), attn (B, n_heads, S, S)).
    """
    B, S, D = query.shape
    d_k = D // n_heads
    inv_scale = 1.0 / math.sqrt(d_k)

    q2d = query.reshape(B * S, D)
    k2d = key.reshape(B * S, D)
    v2d = value.reshape(B * S, D)

    # Projections (y = x @ W.T); no weight transposes materialized.
    # TODO(synk): fuse W_q/W_k/W_v into one (3D, D) projection when
    #             query is key is value (self-attention) to stream x once.
    def split_heads(y2d):
        return y2d.reshape(B, S, n_heads, d_k).transpose(0, 2, 1, 3)

    Q = split_heads(_pallas_linear(q2d, params["W_q"]))
    K = split_heads(_pallas_linear(k2d, params["W_k"]))
    V = split_heads(_pallas_linear(v2d, params["W_v"]))

    ctx, attn = _pallas_attention(Q, K, V, inv_scale=inv_scale)

    ctx2d = ctx.transpose(0, 2, 1, 3).reshape(B * S, D)   # group_heads
    x = _pallas_linear(ctx2d, params["W_o"], bias=params["b_o"])
    return x.reshape(B, S, D), attn


# ----------------------------- reference (pure JAX) ------------------------------

def _reference(query, key, value, params, n_heads):
    B, S, D = query.shape
    d_k = D // n_heads
    scale = math.sqrt(d_k)

    def split(x):
        return x.reshape(B, S, n_heads, d_k).transpose(0, 2, 1, 3)

    Q = split(query @ params["W_q"].T)
    K = split(key @ params["W_k"].T)
    V = split(value @ params["W_v"].T)
    s = jnp.einsum("bhqd,bhkd->bhqk", Q, K) / scale
    p = jax.nn.softmax(s, axis=-1)
    ctx = jnp.einsum("bhqk,bhkd->bhqd", p, V)
    x = ctx.transpose(0, 2, 1, 3).reshape(B, S, D)
    x = x @ params["W_o"].T + params["b_o"]
    return x, p


# ----------------------------- main ----------------------------------------------

if __name__ == "__main__":
    B, S, D, H = 2, 8, 32, 4

    key = jax.random.PRNGKey(0)
    ks = jax.random.split(key, 8)
    bound = 1.0 / math.sqrt(D)
    params = {
        "W_q": jax.random.uniform(ks[0], (D, D), jnp.float32, -bound, bound),
        "W_k": jax.random.uniform(ks[1], (D, D), jnp.float32, -bound, bound),
        "W_v": jax.random.uniform(ks[2], (D, D), jnp.float32, -bound, bound),
        "W_o": jax.random.uniform(ks[3], (D, D), jnp.float32, -bound, bound),
        "b_o": jax.random.uniform(ks[4], (D,), jnp.float32, -bound, bound),
    }

    query = jax.random.normal(ks[5], (B, S, D), jnp.float32)
    key_in = jax.random.normal(ks[6], (B, S, D), jnp.float32)
    value = jax.random.normal(ks[7], (B, S, D), jnp.float32)

    fwd = jax.jit(multi_head_attention, static_argnums=(4,))
    out, attn = fwd(query, key_in, value, params, H)
    out = jax.block_until_ready(out)
    attn = jax.block_until_ready(attn)

    ref_out, ref_attn = _reference(query, key_in, value, params, H)
    assert out.shape == (B, S, D) and attn.shape == (B, H, S, S)
    # Exact softmax division -> tighter tolerances than the previous (approx-recip) version.
    assert jnp.allclose(out, ref_out, atol=1e-3, rtol=1e-3)
    assert jnp.allclose(attn, ref_attn, atol=1e-3, rtol=1e-3)

    print("KERNEL_OK")
</pallas_src>

<mosaic_0001>
module attributes {stable_mosaic.version = 11 : i64} {
  func.func @_matmul_nt_kernel(%arg0: i32, %arg1: i32, %arg2: i32, %arg3: memref<16x32xf32, #tpu.memory_space<vmem>>, %arg4: memref<32x32xf32, #tpu.memory_space<vmem>>, %arg5: memref<16x32xf32, #tpu.memory_space<vmem>>, %arg6: memref<16x32xf32, #tpu.memory_space<vmem>>) attributes {dimension_semantics = [#tpu.dimension_semantics<parallel>, #tpu.dimension_semantics<parallel>, #tpu.dimension_semantics<arbitrary>], iteration_bounds = array<i64: 1, 1, 1>, scalar_prefetch = 0 : i64, scratch_operands = 1 : i64, tpu.core_type = #tpu.core_type<tc>, window_params = [{transform_indices = @transform_0, window_bounds = array<i64: 16, 32>}, {transform_indices = @transform_1, window_bounds = array<i64: 32, 32>}, {transform_indices = @transform_2, window_bounds = array<i64: 16, 32>}]} {
    %c0_i32 = arith.constant 0 : i32
    %0 = arith.cmpi eq, %arg2, %c0_i32 : i32
    %1 = arith.extui %0 : i1 to i32
    %c0_i32_0 = arith.constant 0 : i32
    %2 = arith.cmpi ne, %1, %c0_i32_0 : i32
    scf.if %2 {
      %cst_10 = arith.constant 0.000000e+00 : f32
      %12 = vector.broadcast %cst_10 : f32 to vector<16x32xf32>
      %c0_11 = arith.constant 0 : index
      %c0_12 = arith.constant 0 : index
      %13 = vector.load %arg6[%c0_11, %c0_12] : memref<16x32xf32, #tpu.memory_space<vmem>>, vector<16x32xf32>
      tpu.vector_store %arg6[%c0_11, %c0_12], %12 {strides = array<i32>} : memref<16x32xf32, #tpu.memory_space<vmem>>, vector<16x32xf32>,
    } else {
    }
    %c0 = arith.constant 0 : index
    %c0_1 = arith.constant 0 : index
    %3 = vector.load %arg6[%c0, %c0_1] : memref<16x32xf32, #tpu.memory_space<vmem>>, vector<16x32xf32>
    %c0_2 = arith.constant 0 : index
    %c0_3 = arith.constant 0 : index
    %4 = vector.load %arg3[%c0_2, %c0_3] : memref<16x32xf32, #tpu.memory_space<vmem>>, vector<16x32xf32>
    %c0_4 = arith.constant 0 : index
    %c0_5 = arith.constant 0 : index
    %5 = vector.load %arg4[%c0_4, %c0_5] : memref<32x32xf32, #tpu.memory_space<vmem>>, vector<32x32xf32>
    %cst = arith.constant dense<0.000000e+00> : vector<16x32xf32>
    %6 = tpu.matmul %4, %5, %cst {dimension_numbers = #tpu.dot_dimension_numbers<[1], [1], [0], [0], [0, 0, 1, 0], [], []>} : vector<16x32xf32>, vector<32x32xf32>, vector<16x32xf32> -> vector<16x32xf32>
    %7 = arith.addf %3, %6 : vector<16x32xf32>
    %c0_6 = arith.constant 0 : index
    %c0_7 = arith.constant 0 : index
    %8 = vector.load %arg6[%c0_6, %c0_7] : memref<16x32xf32, #tpu.memory_space<vmem>>, vector<16x32xf32>
    tpu.vector_store %arg6[%c0_6, %c0_7], %7 {strides = array<i32>} : memref<16x32xf32, #tpu.memory_space<vmem>>, vector<16x32xf32>,
    %c0_i32_8 = arith.constant 0 : i32
    %9 = arith.cmpi eq, %arg2, %c0_i32_8 : i32
    %10 = arith.extui %9 : i1 to i32
    %c0_i32_9 = arith.constant 0 : i32
    %11 = arith.cmpi ne, %10, %c0_i32_9 : i32
    scf.if %11 {
      %c0_10 = arith.constant 0 : index
      %c0_11 = arith.constant 0 : index
      %12 = vector.load %arg6[%c0_10, %c0_11] : memref<16x32xf32, #tpu.memory_space<vmem>>, vector<16x32xf32>
      %c0_12 = arith.constant 0 : index
      %c0_13 = arith.constant 0 : index
      %13 = vector.load %arg5[%c0_12, %c0_13] : memref<16x32xf32, #tpu.memory_space<vmem>>, vector<16x32xf32>
      tpu.vector_store %arg5[%c0_12, %c0_13], %12 {strides = array<i32>} : memref<16x32xf32, #tpu.memory_space<vmem>>, vector<16x32xf32>,
    } else {
    }
    return
  }
  func.func @transform_0(%arg0: i32, %arg1: i32, %arg2: i32) -> (i32, i32) {
    %c0_i32 = arith.constant 0 : i32
    return %arg0, %arg2 : i32, i32
  }
  func.func @transform_1(%arg0: i32, %arg1: i32, %arg2: i32) -> (i32, i32) {
    %c0_i32 = arith.constant 0 : i32
    return %arg1, %arg2 : i32, i32
  }
  func.func @transform_2(%arg0: i32, %arg1: i32, %arg2: i32) -> (i32, i32) {
    %c0_i32 = arith.constant 0 : i32
    return %arg0, %arg1 : i32, i32
  }
}

module attributes {stable_mosaic.version = 11 : i64} {
  func.func @_matmul_nt_kernel(%arg0: i32, %arg1: i32, %arg2: i32, %arg3: memref<16x32xf32, #tpu.memory_space<vmem>>, %arg4: memref<32x32xf32, #tpu.memory_space<vmem>>, %arg5: memref<16x32xf32, #tpu.memory_space<vmem>>, %arg6: memref<16x32xf32, #tpu.memory_space<vmem>>) attributes {dimension_semantics = [#tpu.dimension_semantics<parallel>, #tpu.dimension_semantics<parallel>, #tpu.dimension_semantics<arbitrary>], iteration_bounds = array<i64: 1, 1, 1>, scalar_prefetch = 0 : i64, scratch_operands = 1 : i64, tpu.core_type = #tpu.core_type<tc>, window_params = [{transform_indices = @transform_0, window_bounds = array<i64: 16, 32>}, {transform_indices = @transform_1, window_bounds = array<i64: 32, 32>}, {transform_indices = @transform_2, window_bounds = array<i64: 16, 32>}]} {
    %c0_i32 = arith.constant 0 : i32
    %0 = arith.cmpi eq, %arg2, %c0_i32 : i32
    %1 = arith.extui %0 : i1 to i32
    %c0_i32_0 = arith.constant 0 : i32
    %2 = arith.cmpi ne, %1, %c0_i32_0 : i32
    scf.if %2 {
      %cst_10 = arith.constant 0.000000e+00 : f32
      %12 = vector.broadcast %cst_10 : f32 to vector<16x32xf32>
      %c0_11 = arith.constant 0 : index
      %c0_12 = arith.constant 0 : index
      %13 = vector.load %arg6[%c0_11, %c0_12] : memref<16x32xf32, #tpu.memory_space<vmem>>, vector<16x32xf32>
      tpu.vector_store %arg6[%c0_11, %c0_12], %12 {strides = array<i32>} : memref<16x32xf32, #tpu.memory_space<vmem>>, vector<16x32xf32>,
    } else {
    }
    %c0 = arith.constant 0 : index
    %c0_1 = arith.constant 0 : index
    %3 = vector.load %arg6[%c0, %c0_1] : memref<16x32xf32, #tpu.memory_space<vmem>>, vector<16x32xf32>
    %c0_2 = arith.constant 0 : index
    %c0_3 = arith.constant 0 : index
    %4 = vector.load %arg3[%c0_2, %c0_3] : memref<16x32xf32, #tpu.memory_space<vmem>>, vector<16x32xf32>
    %c0_4 = arith.constant 0 : index
    %c0_5 = arith.constant 0 : index
    %5 = vector.load %arg4[%c0_4, %c0_5] : memref<32x32xf32, #tpu.memory_space<vmem>>, vector<32x32xf32>
    %cst = arith.constant dense<0.000000e+00> : vector<16x32xf32>
    %6 = tpu.matmul %4, %5, %cst {dimension_numbers = #tpu.dot_dimension_numbers<[1], [1], [0], [0], [0, 0, 1, 0], [], []>} : vector<16x32xf32>, vector<32x32xf32>, vector<16x32xf32> -> vector<16x32xf32>
    %7 = arith.addf %3, %6 : vector<16x32xf32>
    %c0_6 = arith.constant 0 : index
    %c0_7 = arith.constant 0 : index
    %8 = vector.load %arg6[%c0_6, %c0_7] : memref<16x32xf32, #tpu.memory_space<vmem>>, vector<16x32xf32>
    tpu.vector_store %arg6[%c0_6, %c0_7], %7 {strides = array<i32>} : memref<16x32xf32, #tpu.memory_space<vmem>>, vector<16x32xf32>,
    %c0_i32_8 = arith.constant 0 : i32
    %9 = arith.cmpi eq, %arg2, %c0_i32_8 : i32
    %10 = arith.extui %9 : i1 to i32
    %c0_i32_9 = arith.constant 0 : i32
    %11 = arith.cmpi ne, %10, %c0_i32_9 : i32
    scf.if %11 {
      %c0_10 = arith.constant 0 : index
      %c0_11 = arith.constant 0 : index
      %12 = vector.load %arg6[%c0_10, %c0_11] : memref<16x32xf32, #tpu.memory_space<vmem>>, vector<16x32xf32>
      %c0_12 = arith.constant 0 : index
      %c0_13 = arith.constant 0 : index
      %13 = vector.load %arg5[%c0_12, %c0_13] : memref<16x32xf32, #tpu.memory_space<vmem>>, vector<16x32xf32>
      tpu.vector_store %arg5[%c0_12, %c0_13], %12 {strides = array<i32>} : memref<16x32xf32, #tpu.memory_space<vmem>>, vector<16x32xf32>,
    } else {
    }
    return
  }
  func.func @transform_0(%arg0: i32, %arg1: i32, %arg2: i32) -> (i32, i32) {
    %c0_i32 = arith.constant 0 : i32
    return %arg0, %arg2 : i32, i32
  }
  func.func @transform_1(%arg0: i32, %arg1: i32, %arg2: i32) -> (i32, i32) {
    %c0_i32 = arith.constant 0 : i32
    return %arg1, %arg2 : i32, i32
  }
  func.func @transform_2(%arg0: i32, %arg1: i32, %arg2: i32) -> (i32, i32) {
    %c0_i32 = arith.constant 0 : i32
    return %arg0, %arg1 : i32, i32
  }
}

module attributes {stable_mosaic.version = 11 : i64} {
  func.func @_attn_kernel(%arg0: i32, %arg1: i32, %arg2: i32, %arg3: memref<1x1x8x8xf32, #tpu.memory_space<vmem>>, %arg4: memref<1x1x8x8xf32, #tpu.memory_space<vmem>>, %arg5: memref<1x1x8x8xf32, #tpu.memory_space<vmem>>, %arg6: memref<1x1x8x8xf32, #tpu.memory_space<vmem>>, %arg7: memref<1x1x8x8xf32, #tpu.memory_space<vmem>>) attributes {dimension_semantics = [#tpu.dimension_semantics<parallel>, #tpu.dimension_semantics<parallel>, #tpu.dimension_semantics<parallel>], iteration_bounds = array<i64: 2, 4, 1>, scalar_prefetch = 0 : i64, scratch_operands = 0 : i64, tpu.core_type = #tpu.core_type<tc>, window_params = [{transform_indices = @transform_0, window_bounds = array<i64: 1, 1, 8, 8>}, {transform_indices = @transform_1, window_bounds = array<i64: 1, 1, 8, 8>}, {transform_indices = @transform_2, window_bounds = array<i64: 1, 1, 8, 8>}, {transform_indices = @transform_3, window_bounds = array<i64: 1, 1, 8, 8>}, {transform_indices = @transform_4, window_bounds = array<i64: 1, 1, 8, 8>}]} {
    %c0 = arith.constant 0 : index
    %c0_0 = arith.constant 0 : index
    %c0_1 = arith.constant 0 : index
    %c0_2 = arith.constant 0 : index
    %0 = vector.load %arg3[%c0, %c0_0, %c0_1, %c0_2] : memref<1x1x8x8xf32, #tpu.memory_space<vmem>>, vector<1x1x8x8xf32>
    %1 = vector.shape_cast %0 : vector<1x1x8x8xf32> to vector<8x8xf32>
    %c0_3 = arith.constant 0 : index
    %c0_4 = arith.constant 0 : index
    %c0_5 = arith.constant 0 : index
    %c0_6 = arith.constant 0 : index
    %2 = vector.load %arg4[%c0_3, %c0_4, %c0_5, %c0_6] : memref<1x1x8x8xf32, #tpu.memory_space<vmem>>, vector<1x1x8x8xf32>
    %3 = vector.shape_cast %2 : vector<1x1x8x8xf32> to vector<8x8xf32>
    %c0_7 = arith.constant 0 : index
    %c0_8 = arith.constant 0 : index
    %c0_9 = arith.constant 0 : index
    %c0_10 = arith.constant 0 : index
    %4 = vector.load %arg5[%c0_7, %c0_8, %c0_9, %c0_10] : memref<1x1x8x8xf32, #tpu.memory_space<vmem>>, vector<1x1x8x8xf32>
    %5 = vector.shape_cast %4 : vector<1x1x8x8xf32> to vector<8x8xf32>
    %cst = arith.constant dense<0.000000e+00> : vector<8x8xf32>
    %6 = tpu.matmul %1, %3, %cst {dimension_numbers = #tpu.dot_dimension_numbers<[1], [1], [0], [0], [0, 0, 1, 0], [], []>} : vector<8x8xf32>, vector<8x8xf32>, vector<8x8xf32> -> vector<8x8xf32>
    %cst_11 = arith.constant 0.353553385 : f32
    %7 = vector.broadcast %cst_11 : f32 to vector<8x8xf32>
    %8 = arith.mulf %6, %7 : vector<8x8xf32>
    %cst_12 = arith.constant dense<0xFF800000> : vector<8xf32>
    %9 = vector.multi_reduction <maximumf>, %8, %cst_12 [1] : vector<8x8xf32> to vector<8xf32>
    %10 = vector.shape_cast %9 : vector<8xf32> to vector<8x1xf32>
    %11 = vector.broadcast %10 : vector<8x1xf32> to vector<8x8xf32>
    %12 = arith.subf %8, %11 : vector<8x8xf32>
    %13 = math.exp %12 : vector<8x8xf32>
    %cst_13 = arith.constant dense<0.000000e+00> : vector<8xf32>
    %14 = vector.multi_reduction <add>, %13, %cst_13 [1] : vector<8x8xf32> to vector<8xf32>
    %15 = vector.shape_cast %14 : vector<8xf32> to vector<8x1xf32>
    %16 = vector.broadcast %15 : vector<8x1xf32> to vector<8x8xf32>
    %17 = arith.divf %13, %16 : vector<8x8xf32>
    %c0_14 = arith.constant 0 : index
    %c0_15 = arith.constant 0 : index
    %c0_16 = arith.constant 0 : index
    %c0_17 = arith.constant 0 : index
    %18 = vector.load %arg7[%c0_14, %c0_15, %c0_16, %c0_17] : memref<1x1x8x8xf32, #tpu.memory_space<vmem>>, vector<1x1x8x8xf32>
    %19 = vector.shape_cast %18 : vector<1x1x8x8xf32> to vector<8x8xf32>
    %20 = vector.shape_cast %17 : vector<8x8xf32> to vector<1x1x8x8xf32>
    tpu.vector_store %arg7[%c0_14, %c0_15, %c0_16, %c0_17], %20 {strides = array<i32>} : memref<1x1x8x8xf32, #tpu.memory_space<vmem>>, vector<1x1x8x8xf32>,
    %cst_18 = arith.constant dense<0.000000e+00> : vector<8x8xf32>
    %21 = tpu.matmul %17, %5, %cst_18 {dimension_numbers = #tpu.dot_dimension_numbers<[1], [0], [0], [1], [0, 0, 1, 1], [], []>} : vector<8x8xf32>, vector<8x8xf32>, vector<8x8xf32> -> vector<8x8xf32>
    %c0_19 = arith.constant 0 : index
    %c0_20 = arith.constant 0 : index
    %c0_21 = arith.constant 0 : index
    %c0_22 = arith.constant 0 : index
    %22 = vector.load %arg6[%c0_19, %c0_20, %c0_21, %c0_22] : memref<1x1x8x8xf32, #tpu.memory_space<vmem>>, vector<1x1x8x8xf32>
    %23 = vector.shape_cast %22 : vector<1x1x8x8xf32> to vector<8x8xf32>
    %24 = vector.shape_cast %21 : vector<8x8xf32> to vector<1x1x8x8xf32>
    tpu.vector_store %arg6[%c0_19, %c0_20, %c0_21, %c0_22], %24 {strides = array<i32>} : memref<1x1x8x8xf32, #tpu.memory_space<vmem>>, vector<1x1x8x8xf32>,
    return
  }
  func.func @transform_0(%arg0: i32, %arg1: i32, %arg2: i32) -> (i32, i32, i32, i32) {
    %c0_i32 = arith.constant 0 : i32
    %c0_i32_0 = arith.constant 0 : i32
    return %arg0, %arg1, %arg2, %c0_i32 : i32, i32, i32, i32
  }
  func.func @transform_1(%arg0: i32, %arg1: i32, %arg2: i32) -> (i32, i32, i32, i32) {
    %c0_i32 = arith.constant 0 : i32
    %c0_i32_0 = arith.constant 0 : i32
    %c0_i32_1 = arith.constant 0 : i32
    return %arg0, %arg1, %c0_i32, %c0_i32_0 : i32, i32, i32, i32
  }
  func.func @transform_2(%arg0: i32, %arg1: i32, %arg2: i32) -> (i32, i32, i32, i32) {
    %c0_i32 = arith.constant 0 : i32
    %c0_i32_0 = arith.constant 0 : i32
    %c0_i32_1 = arith.constant 0 : i32
    return %arg0, %arg1, %c0_i32, %c0_i32_0 : i32, i32, i32, i32
  }
  func.func @transform_3(%arg0: i32, %arg1: i32, %arg2: i32) -> (i32, i32, i32, i32) {
    %c0_i32 = arith.constant 0 : i32
    %c0_i32_0 = arith.constant 0 : i32
    return %arg0, %arg1, %arg2, %c0_i32 : i32, i32, i32, i32
  }
  func.func @transform_4(%arg0: i32, %arg1: i32, %arg2: i32) -> (i32, i32, i32, i32) {
    %c0_i32 = arith.constant 0 : i32
    %c0_i32_0 = arith.constant 0 : i32
    return %arg0, %arg1, %arg2, %c0_i32 : i32, i32, i32, i32
  }
}

module attributes {stable_mosaic.version = 11 : i64} {
  func.func @_matmul_nt_bias_kernel(%arg0: i32, %arg1: i32, %arg2: i32, %arg3: memref<16x32xf32, #tpu.memory_space<vmem>>, %arg4: memref<32x32xf32, #tpu.memory_space<vmem>>, %arg5: memref<1x32xf32, #tpu.memory_space<vmem>>, %arg6: memref<16x32xf32, #tpu.memory_space<vmem>>, %arg7: memref<16x32xf32, #tpu.memory_space<vmem>>) attributes {dimension_semantics = [#tpu.dimension_semantics<parallel>, #tpu.dimension_semantics<parallel>, #tpu.dimension_semantics<arbitrary>], iteration_bounds = array<i64: 1, 1, 1>, scalar_prefetch = 0 : i64, scratch_operands = 1 : i64, tpu.core_type = #tpu.core_type<tc>, window_params = [{transform_indices = @transform_0, window_bounds = array<i64: 16, 32>}, {transform_indices = @transform_1, window_bounds = array<i64: 32, 32>}, {transform_indices = @transform_2, window_bounds = array<i64: 1, 32>}, {transform_indices = @transform_3, window_bounds = array<i64: 16, 32>}]} {
    %c0_i32 = arith.constant 0 : i32
    %0 = arith.cmpi eq, %arg2, %c0_i32 : i32
    %1 = arith.extui %0 : i1 to i32
    %c0_i32_0 = arith.constant 0 : i32
    %2 = arith.cmpi ne, %1, %c0_i32_0 : i32
    scf.if %2 {
      %cst_10 = arith.constant 0.000000e+00 : f32
      %12 = vector.broadcast %cst_10 : f32 to vector<16x32xf32>
      %c0_11 = arith.constant 0 : index
      %c0_12 = arith.constant 0 : index
      %13 = vector.load %arg7[%c0_11, %c0_12] : memref<16x32xf32, #tpu.memory_space<vmem>>, vector<16x32xf32>
      tpu.vector_store %arg7[%c0_11, %c0_12], %12 {strides = array<i32>} : memref<16x32xf32, #tpu.memory_space<vmem>>, vector<16x32xf32>,
    } else {
    }
    %c0 = arith.constant 0 : index
    %c0_1 = arith.constant 0 : index
    %3 = vector.load %arg7[%c0, %c0_1] : memref<16x32xf32, #tpu.memory_space<vmem>>, vector<16x32xf32>
    %c0_2 = arith.constant 0 : index
    %c0_3 = arith.constant 0 : index
    %4 = vector.load %arg3[%c0_2, %c0_3] : memref<16x32xf32, #tpu.memory_space<vmem>>, vector<16x32xf32>
    %c0_4 = arith.constant 0 : index
    %c0_5 = arith.constant 0 : index
    %5 = vector.load %arg4[%c0_4, %c0_5] : memref<32x32xf32, #tpu.memory_space<vmem>>, vector<32x32xf32>
    %cst = arith.constant dense<0.000000e+00> : vector<16x32xf32>
    %6 = tpu.matmul %4, %5, %cst {dimension_numbers = #tpu.dot_dimension_numbers<[1], [1], [0], [0], [0, 0, 1, 0], [], []>} : vector<16x32xf32>, vector<32x32xf32>, vector<16x32xf32> -> vector<16x32xf32>
    %7 = arith.addf %3, %6 : vector<16x32xf32>
    %c0_6 = arith.constant 0 : index
    %c0_7 = arith.constant 0 : index
    %8 = vector.load %arg7[%c0_6, %c0_7] : memref<16x32xf32, #tpu.memory_space<vmem>>, vector<16x32xf32>
    tpu.vector_store %arg7[%c0_6, %c0_7], %7 {strides = array<i32>} : memref<16x32xf32, #tpu.memory_space<vmem>>, vector<16x32xf32>,
    %c0_i32_8 = arith.constant 0 : i32
    %9 = arith.cmpi eq, %arg2, %c0_i32_8 : i32
    %10 = arith.extui %9 : i1 to i32
    %c0_i32_9 = arith.constant 0 : i32
    %11 = arith.cmpi ne, %10, %c0_i32_9 : i32
    scf.if %11 {
      %c0_10 = arith.constant 0 : index
      %c0_11 = arith.constant 0 : index
      %12 = vector.load %arg7[%c0_10, %c0_11] : memref<16x32xf32, #tpu.memory_space<vmem>>, vector<16x32xf32>
      %c0_12 = arith.constant 0 : index
      %c0_13 = arith.constant 0 : index
      %13 = vector.load %arg5[%c0_12, %c0_13] : memref<1x32xf32, #tpu.memory_space<vmem>>, vector<1x32xf32>
      %14 = vector.broadcast %13 : vector<1x32xf32> to vector<16x32xf32>
      %15 = arith.addf %12, %14 : vector<16x32xf32>
      %c0_14 = arith.constant 0 : index
      %c0_15 = arith.constant 0 : index
      %16 = vector.load %arg6[%c0_14, %c0_15] : memref<16x32xf32, #tpu.memory_space<vmem>>, vector<16x32xf32>
      tpu.vector_store %arg6[%c0_14, %c0_15], %15 {strides = array<i32>} : memref<16x32xf32, #tpu.memory_space<vmem>>, vector<16x32xf32>,
    } else {
    }
    return
  }
  func.func @transform_0(%arg0: i32, %arg1: i32, %arg2: i32) -> (i32, i32) {
    %c0_i32 = arith.constant 0 : i32
    return %arg0, %arg2 : i32, i32
  }
  func.func @transform_1(%arg0: i32, %arg1: i32, %arg2: i32) -> (i32, i32) {
    %c0_i32 = arith.constant 0 : i32
    return %arg1, %arg2 : i32, i32
  }
  func.func @transform_2(%arg0: i32, %arg1: i32, %arg2: i32) -> (i32, i32) {
    %c0_i32 = arith.constant 0 : i32
    %c0_i32_0 = arith.constant 0 : i32
    return %c0_i32, %arg1 : i32, i32
  }
  func.func @transform_3(%arg0: i32, %arg1: i32, %arg2: i32) -> (i32, i32) {
    %c0_i32 = arith.constant 0 : i32
    return %arg0, %arg1 : i32, i32
  }
}

</mosaic_0001>

<bundles_post_ra>
// kernel: multi_head_attention.6
= control target key start
LH: loop header
LB: loop body
LE: loop exit
PB: predicated region body
PF: predicated region fallthrough
CT: control target
= control target key end

     0   :  { %vm15_vm0 = vcmask 261120   ;;  %v171_v2 = vmov 0.0   ;;  %s221_s1 = inlined_call_operand.vmem [shape: f32[32,32], index: 1, kind: input, shape index: {}]   ;;  %s222_s0 = inlined_call_operand.vmem [shape: f32[16,32], index: 0, kind: input, shape index: {}]   ;;  %s223_s2 = inlined_call_operand.vmem [shape: f32[16,32], index: 2, kind: output, shape index: {}]  }
   0x1   :  { %v22_v0 = vld [vmem:[%s221_s1] sm:$0xff]  ;;  %v23_v1 = vld [vmem:[%s221_s1 + $0x8] sm:$0xff]  ;;  %vm159_vm1 = vmpackc.low %vm15_vm0, %vm15_vm0  ;;  %17 = vst.msk [vmem:[#allocation2 + $0x8] sm:$0xff] %vm15_vm0, %v171_v2 }
   0x2   :  { %16 = vst.msk [vmem:[#allocation2] sm:$0xff] %vm15_vm0, %v171_v2  ;;  %v158_v3 = vpack.c.bf16 %v23_v1, %v22_v0  ;;  %v24_v4 = vld [vmem:[%s221_s1 + $0x10] sm:$0xff]  ;;  %v25_v5 = vld [vmem:[%s221_s1 + $0x18] sm:$0xff]  ;;  %v20_v6 = vld [vmem:[%s222_s0] sm:$0xff] }
   0x3   :  { %v164_v7 = vpack.c.bf16 %v25_v5, %v24_v4  ;;  %155 = vmatprep.mubr.msk.f32.mxu0 %vm15_vm0, %v20_v6  ;;  %v21_v8 = vld [vmem:[%s222_s0 + $0x8] sm:$0xff] }
   0x4   :  { %160 = vmatprep.subr.msk.bf16.mxu0 %vm159_vm1, %v158_v3 }
   0x5   :  { %163 = vmatpush3.bf16.xpose.msk.msra.mxu0 %vm159_vm1, %v158_v3 }
   0x6   :  { %166 = vmatprep.subr.msk.bf16.mxu0 %vm159_vm1, %v164_v7 }
   0x8   :  { %v19_v9 = vld [vmem:[#allocation2 + $0x8] sm:$0xff] }
   0x9   :  { %v18_v10 = vld [vmem:[#allocation2] sm:$0xff] }
   0xd   :  { %169 = vmatpush3.bf16.xpose.msk.msra.mxu0 %vm159_vm1, %v164_v7 }
  0x14   :  { %156 = vmatmul.mubr.msk.f32.vlgmr.msra.gmra.mrb[0].mxu0 %vm15_vm0, %v21_v8 }
  0xe7   :  { %v157_v11 = vpop.f32.mrb[0].mxu0 }
  0xe8   :  { %v121_v12 = vadd.f32 %v157_v11, %v19_v9  ;;  %v111_v13 = vpop.f32.mrb[1].mxu0 }
  0xe9   :  { %v120_v14 = vadd.f32 %v111_v13, %v18_v10 }
  0xea   :  { %123 = vst.msk [vmem:[#allocation2 + $0x8] sm:$0xff] %vm15_vm0, %v121_v12 }
  0xeb   :  { %122 = vst.msk [vmem:[#allocation2] sm:$0xff] %vm15_vm0, %v120_v14 }
  0xf1   :  { %v128_v15 = vld [vmem:[#allocation2 + $0x8] sm:$0xff] }
  0xf2   :  { %130 = vst.msk [vmem:[%s223_s2 + $0x8] sm:$0xff] %vm15_vm0, %v128_v15  ;;  %v127_v16 = vld [vmem:[#allocation2] sm:$0xff] }
  0xf3   :  { %129 = vst.msk [vmem:[%s223_s2] sm:$0xff] %vm15_vm0, %v127_v16 }

// kernel: multi_head_attention.5
= control target key start
LH: loop header
LB: loop body
LE: loop exit
PB: predicated region body
PF: predicated region fallthrough
CT: control target
= control target key end

     0   :  { %7 = vsyncpa [#allocation4], 0  ;;  %s213_s9 = smov [#allocation3]   ;;  %s272_s0 = inlined_call_operand.hbm [shape: f32[16,32], index: 0, kind: input, shape index: {}]   ;;  %s273_s1 = inlined_call_operand.vmem [shape: f32[32,32], index: 1, kind: input, shape index: {}]   ;;  %s274_s2 = inlined_call_operand.vmem [shape: f32[16,32], index: 2, kind: output, shape index: {}]  }
   0x1   :  { %s13_s10 = sshll.u32 %s213_s9, 4  ;;  %s189_s13 = scalar_lea.hbm %s272_s0, 256  ;;  %s14_s10 = int_to_ptr.vmem [resolvable:$true] %s13_s10 }
   0x2   :  { %p190_p0 = scmp.ne.s32.totalorder %s272_s0, %s189_s13  ;;  %p193_p1 = scmp.lt.u32.totalorder %s189_s13, %s272_s0 }
   0x4   :  { %p195_p2 = pnand %p193_p1, %p190_p0 }
   0x6   :  { %198 = shalt.err (!%p195_p2)
}
   0x7   :  { %s199_s18 = scalar_lea.vmem %s14_s10, 256  ;;  %p204_p4 = scmp.lt.s32.totalorder %s14_s10, %s14_s10 }
   0x8   :  { %p200_p3 = scmp.ne.s32.totalorder %s14_s10, %s199_s18  ;;  %p205_p5 = scmp.lt.s32.totalorder %s199_s18, %s199_s18 }
   0xa   :  { %p206_p6 = por %p205_p5, %p204_p4 }
   0xc   :  { %p207_p7 = pnand %p206_p6, %p200_p3 }
   0xe   :  { %210 = shalt.err (!%p207_p7)
}
   0xf   :  { %s214_s19 = smov 128   ;;  %s215_s20 = smov 8  }
  0x10   :  { %19 = dma.hbm_to_vmem [thread:$0]  %s272_s0, 256, %s14_s10, [#allocation4], %s214_s19, %s214_s19, %s215_s20  }
  0x11   :  { %211 = dma.done.wait [#allocation4], 256  }
  0x12   :  { %212 = vsyncadd [#allocation4], 4294967040  ;;  %vm29_vm0 = vcmask 261120   ;;  %v216_v0 = vmov 0.0   ;;  %v36_v1 = vld [vmem:[%s273_s1] sm:$0xff]  ;;  %v37_v2 = vld [vmem:[%s273_s1 + $0x8] sm:$0xff] }
  0x13   :  { %31 = vst.msk [vmem:[#allocation2 + $0x8] sm:$0xff] %vm29_vm0, %v216_v0  ;;  %30 = vst.msk [vmem:[#allocation2] sm:$0xff] %vm29_vm0, %v216_v0  ;;  %v38_v3 = vld [vmem:[%s273_s1 + $0x10] sm:$0xff]  ;;  %v173_v4 = vpack.c.bf16 %v37_v2, %v36_v1  ;;  %v39_v5 = vld [vmem:[%s273_s1 + $0x18] sm:$0xff] }
  0x14   :  { %vm174_vm1 = vmpackc.low %vm29_vm0, %vm29_vm0  ;;  %v34_v6 = vld [vmem:[#allocation3] sm:$0xff]  ;;  %v179_v7 = vpack.c.bf16 %v39_v5, %v38_v3  ;;  %v35_v8 = vld [vmem:[#allocation3 + $0x8] sm:$0xff] }
  0x15   :  { %170 = vmatprep.mubr.msk.f32.mxu0 %vm29_vm0, %v34_v6  ;;  %175 = vmatprep.subr.msk.bf16.mxu0 %vm174_vm1, %v173_v4 }
  0x16   :  { %178 = vmatpush3.bf16.xpose.msk.msra.mxu0 %vm174_vm1, %v173_v4 }
  0x17   :  { %181 = vmatprep.subr.msk.bf16.mxu0 %vm174_vm1, %v179_v7 }
  0x1a   :  { %v33_v9 = vld [vmem:[#allocation2 + $0x8] sm:$0xff]  ;;  %v32_v10 = vld [vmem:[#allocation2] sm:$0xff] }
  0x1e   :  { %184 = vmatpush3.bf16.xpose.msk.msra.mxu0 %vm174_vm1, %v179_v7 }
  0x25   :  { %171 = vmatmul.mubr.msk.f32.vlgmr.msra.gmra.mrb[0].mxu0 %vm29_vm0, %v35_v8 }
  0xf8   :  { %v172_v11 = vpop.f32.mrb[0].mxu0 }
  0xf9   :  { %v135_v12 = vadd.f32 %v172_v11, %v33_v9  ;;  %v125_v13 = vpop.f32.mrb[1].mxu0 }
  0xfa   :  { %v134_v14 = vadd.f32 %v125_v13, %v32_v10 }
  0xfb   :  { %137 = vst.msk [vmem:[#allocation2 + $0x8] sm:$0xff] %vm29_vm0, %v135_v12 }
  0xfc   :  { %136 = vst.msk [vmem:[#allocation2] sm:$0xff] %vm29_vm0, %v134_v14 }
 0x102   :  { %v142_v15 = vld [vmem:[#allocation2 + $0x8] sm:$0xff] }
 0x103   :  { %144 = vst.msk [vmem:[%s274_s2 + $0x8] sm:$0xff] %vm29_vm0, %v142_v15  ;;  %v141_v16 = vld [vmem:[#allocation2] sm:$0xff] }
 0x104   :  { %143 = vst.msk [vmem:[%s274_s2] sm:$0xff] %vm29_vm0, %v141_v16 }
 0x105   :  { %149 = vsyncpa [#allocation4], 1 }

// kernel: multi_head_attention.8
= control target key start
LH: loop header
LB: loop body
LE: loop exit
PB: predicated region body
PF: predicated region fallthrough
CT: control target
= control target key end

     0   :  { %s1084_s0 = inlined_call_operand.vmem [shape: f32[2,4,8,8], index: 0, kind: input, shape index: {}]   ;;  %s1085_s1 = inlined_call_operand.vmem [shape: f32[2,4,8,8], index: 1, kind: input, shape index: {}]   ;;  %s1086_s2 = inlined_call_operand.vmem [shape: f32[2,4,8,8], index: 2, kind: input, shape index: {}]   ;;  %s1087_s3 = inlined_call_operand.vmem [shape: f32[2,4,8,8], index: 3, kind: output, shape index: {0}]   ;;  %s1088_s4 = inlined_call_operand.hbm [shape: f32[2,4,8,8], index: 4, kind: output, shape index: {1}]  }
   0x1   :  { %1089 = sst [smem:[#allocation5_spill]] %s1084_s0 }
   0x2   :  { %1090 = sst [smem:[#allocation6_spill]] %s1085_s1 }
   0x3   :  { %10 = vsyncpa [#allocation3], 0 }
   0x4   :  { %12 = vsyncpa [#allocation3 + $0x1], 0  ;;  %s931_s15 = smov 0   ;;  %s933_s16 = smov 0  }
   0x5   :  { %s935_s17 = smov 0   ;;  %s937_s18 = smov 0  }
   0x6   :  { %s939_s19 = smov 0   ;;  %s941_s20 = smov 0  }
   0x7   :  { %s943_s21 = smov 0   ;;  %s945_s22 = smov 0  }
   0x8 LB: > { %s694_s23 = sadd.s32 4294967295, %s901_s22   ;;  %s695_s24 = sadd.s32 4294967294, %s901_s22   ;;  %s901_s22 = sphi %s945_s22, %s18_s22   ;;  %s897_s21 = sphi %s943_s21, %s1101_s21   ;;  %s893_s20 = sphi %s941_s20, %s1100_s20   ;;  %s889_s19 = sphi %s939_s19, %s1099_s19   ;;  %s885_s18 = sphi %s937_s18, %s1098_s18   ;;  %s881_s17 = sphi %s935_s17, %s1097_s17   ;;  %s877_s16 = sphi %s933_s16, %s1096_s16   ;;  %s873_s15 = sphi %s931_s15, %s1095_s15  }
   0x9   : > { %s33_s25 = sadd.s32 1, %s893_s20  ;;  %s37_s26 = sadd.s32 1, %s897_s21 }
   0xa   : > { %p35_p0 = scmp.ge.s32.totalorder %s33_s25, 4  ;;  %p174_p1 = scmp.ne.s32.totalorder %s881_s17, %s877_s16 }
   0xb   : > { %p175_p2 = scmp.eq.s32.totalorder %s694_s23, 7  ;;  %p180_p5 = scmp.ne.s32.totalorder %s877_s16, %s873_s15 }
   0xc   : > { %s1103_s25 = smov (%p35_p0, %s33_s25), 0  ;;  %s1105_s26 = smov (!%p35_p0, %s37_s26), %s897_s21 }
   0xd   : > { %s158_s27 = ssub.s32 %s893_s20, %s1103_s25  ;;  %p982_p3 = por %p175_p2, %p174_p1 }
   0xe   : > { %p39_p4 = scmp.ge.s32.totalorder %s1105_s26, 2  ;;  %p181_p6 = scmp.eq.s32.totalorder %s695_s24, 7 }
   0xf   : > { %p698_p7 = scmp.ge.s32.totalorder %s901_s22, 1  ;;  %p235_p9 = scmp.lt.s32.totalorder %s901_s22, 9 }
  0x10   : > { %s1107_s26 = smov (%p39_p4, %s1105_s26), 0  ;;  %p991_p8 = por %p181_p6, %p180_p5 }
  0x11   : > { %s157_s30 = ssub.s32 %s897_s21, %s1107_s26  ;;  %s164_s5 = sadd.s32 1, %s881_s17 }
  0x12   : > { %s159_s6 = sor.u32 %s158_s27, %s157_s30  ;;  %p236_p10 = pnand %p698_p7, %p235_p9 }
  0x13   : > { %p162_p11 = scmp.eq.s32.totalorder %s159_s6, 0  ;;  %p294_p12 = scmp.lt.s32.totalorder (!%p236_p10), %s889_s19, 1  ;;  %v903_v0 = vmov (!%p236_p10), 0.0   ;;  %vm904_vm0 = vmmov (!%p236_p10), 0   ;;  %vm335_vm1 = vcmask (!%p236_p10), 64512  }
  0x14   : > { %239 = sbr.rel (%p236_p10) target bundleno = 778 (0x30a), region = 32  ;;  %p296_p13 = scmp.lt.s32.totalorder (!%p236_p10), %s885_s18, 3  ;;  %720 = vmatprep.subr.mxu0 (!%p236_p10), %v903_v0  ;;  %722 = vmatprep.mubr.msk.f32.mxu0 (!%p236_p10), %vm904_vm0, %v903_v0 }
  0x15   : > { %s1000_s7 = scalar_select %p162_p11, %s881_s17, %s164_s5  }
  0x16   : > { %725 = vmatprep.subr.mxu1 (!%p236_p10), %v903_v0  ;;  %727 = vmatprep.mubr.msk.f32.mxu1 (!%p236_p10), %vm904_vm0, %v903_v0  ;;  %s1093_s1 = sld [smem:[#allocation6_spill]] (!%p236_p10)  ;;  %s1094_s0 = sld [smem:[#allocation5_spill]] (!%p236_p10) }
  0x17   : > { %s712_s13 = sshll.u32 (!%p236_p10), %s889_s19, 2 }
  0x18   : > { %s526_s14 = sadd.s32 (!%p236_p10), %s885_s18, %s712_s13 }
  0x1b   : > { %s295_s8 = scalar_select %p294_p12, %s889_s19, 1 }
  0x1c   : > { %s297_s9 = scalar_select %p296_p13, %s885_s18, 3 }
  0x1d   : > { %s700_s10 = sshll.u32 %s295_s8, 2 }
  0x1e   : > { %s302_s11 = sadd.s32 %s700_s10, %s297_s9  ;;  %s291_s9 = sand.u32 1, %s877_s16  }
  0x1f   : > { %s1006_s12 = sshll.u32 %s302_s11, 3  ;;  %s699_s10 = sshll.u32 %s291_s9, 3 }
  0x20   : > { %s312_s23 = scalar_lea.vmem %s1093_s1, %s1006_s12  ;;  %s304_s30 = scalar_lea.vmem %s1094_s0, %s1006_s12 }
  0x21   : > { %v333_v1 = vld [vmem:[%s312_s23] sm:$0xff]  ;;  %s320_s8 = scalar_lea.vmem %s1086_s2, %s1006_s12  ;;  %s293_s11 = scalar_lea.vmem [#allocation2], %s699_s10 }
  0x22   : > { %721 = vmatpush3.xpose.msk.msra.mxu0 %vm335_vm1, %v333_v1  ;;  %v332_v2 = vld [vmem:[%s304_s30] sm:$0xff]  ;;  %s713_s23 = sshll.u32 %s526_s14, 7  ;;  %s530_s24 = sshll.u32 %s293_s11, 4  ;;  %s531_s24 = int_to_ptr.vmem [resolvable:$true] %s530_s24 }
  0x23   : > { %v334_v12 = vld [vmem:[%s320_s8] sm:$0xff]  ;;  %s1032_s5 = scalar_lea.hbm %s1088_s4, %s713_s23  ;;  %s511_s6 = scalar_lea.sflag [#allocation3], %s291_s9 }
  0x24   : > { %726 = vmatpush3.msra.mxu1 %v334_v12  ;;  %s807_s8 = scalar_lea.vmem %s531_s24, 128  ;;  %s905_s0 = smov [#allocation2]  }
  0x25   : > { %723 = vmatmul.mubr.msk.f32.vlgmr.msra.gmra.mrb[0].mxu0 %vm335_vm1, %v332_v2  ;;  %p808_p0 = scmp.ne.s32.totalorder %s531_s24, %s807_s8  ;;  %s811_s10 = sshll.u32 %s905_s0, 4  ;;  %s812_s10 = int_to_ptr.vmem [resolvable:$false] %s811_s10 }
  0x26   : > { %s813_s1 = scalar_lea.vmem %s812_s10, 256  ;;  %p814_p4 = scmp.lt.s32.totalorder %s531_s24, %s812_s10 }
  0x27   : > { %p809_p1 = pnand %p808_p0, %p982_p3  ;;  %p815_p5 = scmp.lt.s32.totalorder %s813_s1, %s807_s8 }
  0x29   : > { %p810_p2 = pneg %p809_p1  ;;  %p816_p6 = por %p815_p5, %p814_p4 }
  0x2b   : > { %p817_p7 = pnand %p816_p6, %p810_p2 }
  0xf8   : > { %v408_v3 = vpop.f32.mrb[0].mxu0 }
  0xf9   : > { %v412_v4 = vmul.f32 0.35355338, %v408_v3  ;;  %v724_v5 = vpop.f32.mrb[1].mxu0 }
  0xfb   : > { %v413_v6 = vsel %vm335_vm1, %v412_v4, -inf }
  0xfc   : > { %414 = vmax.xlane.f32.xlu0 %v413_v6 }
 0x189   : > { %v415_v7 = vpop.xlane.xlu0 %414 }
 0x18a   : > { %v416_v8 = vsub.f32 %v412_v4, %v415_v7 }
 0x18c   : > { %v417_v9 = vmul.f32 1.442695, %v416_v8 }
 0x18e   : > { %803 = vpow2.f32 %v417_v9 }
 0x198   : > { %v804_v10 = vpop.eup %803 }
 0x199   : > { %v419_v11 = vsel %vm335_vm1, %v804_v10, 0.0 }
 0x19a   : > { %420 = vadd.xlane.f32.xlu0 %v419_v11 }
 0x227   : > { %v421_v13 = vpop.xlane.xlu0 %420 }
 0x228   : > { %805 = vrcp.f32 %v421_v13 }
 0x232   : > { %v806_v14 = vpop.eup %805 }
 0x233   : > { %v423_v15 = vmul.f32 %v806_v14, %v804_v10 }
 0x235   : > { %728 = vmatmul.mubr.msk.f32.vlgmr.msra.gmra.mrb[0].mxu1 %vm335_vm1, %v423_v15  ;;  %424 = vst.msk [vmem:[%s293_s11] sm:$0xff] %vm335_vm1, %v423_v15 }
 0x236   : > { %820 = shalt.err (!%p817_p7)
}
 0x237   : > { %s821_s18 = scalar_lea.hbm %s1032_s5, 128  ;;  %s825_s0 = scalar_lea.hbm %s1088_s4, 1024 }
 0x238   : > { %p822_p9 = scmp.ne.s32.totalorder %s1032_s5, %s821_s18  ;;  %p826_p12 = scmp.lt.u32.totalorder %s1032_s5, %s1088_s4 }
 0x239   : > { %p827_p13 = scmp.lt.u32.totalorder %s825_s0, %s821_s18  ;;  %p829_p1 = scmp.lt.u32.totalorder %s821_s18, %s1032_s5 }
 0x23a   : > { %p823_p10 = pnand %p822_p9, %p982_p3 }
 0x23b   : > { %p828_p0 = por %p827_p13, %p826_p12 }
 0x23c   : > { %p824_p11 = pneg %p823_p10 }
 0x23d   : > { %p830_p2 = por %p829_p1, %p828_p0 }
 0x23f   : > { %p831_p4 = pnand %p830_p2, %p824_p11 }
 0x241   : > { %834 = shalt.err (!%p831_p4)
}
 0x242   : > { %730 = dma.vmem_to_hbm [thread:$0]  (%p982_p3), %s531_s24, 128, %s1032_s5, %s511_s6  }
 0x243   : > { %s331_s23 = scalar_lea.vmem %s1087_s3, %s1006_s12 }
 0x308   : > { %v494_v16 = vpop.f32.mrb[0].mxu1 }
 0x309   : > { %498 = vst.msk [vmem:[%s331_s23] sm:$0xff] %vm335_vm1, %v494_v16  ;;  %v729_v17 = vpop.f32.mrb[1].mxu1 }
 0x30a PF: > { %p736_p5 = scmp.ge.s32.totalorder %s901_s22, 2  ;;  %s556_s27 = sand.u32 1, %s873_s15  }
 0x30b   : > { %s557_s28 = scalar_lea.sflag [#allocation3], %s556_s27 }
 0x30c   : > { %p733_p6 = pnand %p736_p5, %p991_p8 }
 0x30e   : > { %868 = dma.done.wait (!%p733_p6), %s557_s28, 128  }
 0x30f   : > { %870 = vsyncadd (!%p733_p6), %s557_s28, 4294967168  ;;  %s18_s22 = sadd.s32 1, %s901_s22   ;;  %s1095_s15 = smov %s877_s16 }
 0x310   : > { %p15_p3 = scmp.ge.s32.totalorder %s18_s22, 10   ;;  %s1096_s16 = smov %s881_s17 }
 0x311   : > { %s1097_s17 = smov %s1000_s7  ;;  %s1098_s18 = smov %s893_s20 }
 0x312   : > { %s1099_s19 = smov %s897_s21  ;;  %s1100_s20 = smov %s1103_s25 }
 0x313   : > { %s1101_s21 = smov %s1107_s26  ;;  %17 = sbr.rel (!%p15_p3) target bundleno = 8 (0x8), region = 85 }
 0x31a   :  { %562 = vsyncpa [#allocation3], 1 }
 0x31b   :  { %564 = vsyncpa [#allocation3 + $0x1], 1 }

// kernel: multi_head_attention.9
= control target key start
LH: loop header
LB: loop body
LE: loop exit
PB: predicated region body
PF: predicated region fallthrough
CT: control target
= control target key end

     0   :  { %vm19_vm0 = vcmask 261120   ;;  %v224_v6 = vmov 0.0   ;;  %s291_s0 = inlined_call_operand.vmem [shape: f32[16,32], index: 0, kind: input, shape index: {}]   ;;  %s292_s1 = inlined_call_operand.vmem [shape: f32[32,32], index: 1, kind: input, shape index: {}]   ;;  %s293_s2 = inlined_call_operand.vmem [shape: f32[1,32], index: 2, kind: input, shape index: {}]   ;;  %s294_s3 = inlined_call_operand.hbm [shape: f32[16,32], index: 3, kind: output, shape index: {}]  }
   0x1   :  { %v26_v0 = vld [vmem:[%s292_s1] sm:$0xff]  ;;  %v27_v1 = vld [vmem:[%s292_s1 + $0x8] sm:$0xff]  ;;  %v28_v2 = vld [vmem:[%s292_s1 + $0x10] sm:$0xff]  ;;  %21 = vst.msk [vmem:[#allocation2 + $0x8] sm:$0xff] %vm19_vm0, %v224_v6 }
   0x2   :  { %v184_v3 = vpack.c.bf16 %v27_v1, %v26_v0  ;;  %vm185_vm1 = vmpackc.low %vm19_vm0, %vm19_vm0  ;;  %v29_v4 = vld [vmem:[%s292_s1 + $0x18] sm:$0xff]  ;;  %v24_v5 = vld [vmem:[%s291_s0] sm:$0xff]  ;;  %20 = vst.msk [vmem:[#allocation2] sm:$0xff] %vm19_vm0, %v224_v6 }
   0x3   :  { %v190_v7 = vpack.c.bf16 %v29_v4, %v28_v2  ;;  %181 = vmatprep.mubr.msk.f32.mxu0 %vm19_vm0, %v24_v5 }
   0x4   :  { %8 = vsyncpa [#allocation4], 0  ;;  %186 = vmatprep.subr.msk.bf16.mxu0 %vm185_vm1, %v184_v3  ;;  %v25_v8 = vld [vmem:[%s291_s0 + $0x8] sm:$0xff]  ;;  %v166_v15 = vld [vmem:[%s293_s2] ss:$0 sm:$0xff]  ;;  %s225_s25 = smov [#allocation3]  }
   0x5   :  { %189 = vmatpush3.bf16.xpose.msk.msra.mxu0 %vm185_vm1, %v184_v3  ;;  %s149_s26 = sshll.u32 %s225_s25, 4  ;;  %s150_s26 = int_to_ptr.vmem [resolvable:$true] %s149_s26 }
   0x6   :  { %192 = vmatprep.subr.msk.bf16.mxu0 %vm185_vm1, %v190_v7  ;;  %s200_s0 = scalar_lea.vmem %s150_s26, 256  ;;  %p205_p1 = scmp.lt.s32.totalorder %s150_s26, %s150_s26 }
   0x7   :  { %p201_p0 = scmp.ne.s32.totalorder %s150_s26, %s200_s0  ;;  %p206_p2 = scmp.lt.s32.totalorder %s200_s0, %s200_s0 }
   0x8   :  { %v23_v9 = vld [vmem:[#allocation2 + $0x8] sm:$0xff] }
   0x9   :  { %v22_v10 = vld [vmem:[#allocation2] sm:$0xff]  ;;  %p207_p3 = por %p206_p2, %p205_p1 }
   0xb   :  { %p208_p4 = pnand %p207_p3, %p201_p0 }
   0xd   :  { %195 = vmatpush3.bf16.xpose.msk.msra.mxu0 %vm185_vm1, %v190_v7 }
  0x14   :  { %182 = vmatmul.mubr.msk.f32.vlgmr.msra.gmra.mrb[0].mxu0 %vm19_vm0, %v25_v8 }
  0xe7   :  { %v183_v11 = vpop.f32.mrb[0].mxu0 }
  0xe8   :  { %v125_v12 = vadd.f32 %v183_v11, %v23_v9  ;;  %v115_v13 = vpop.f32.mrb[1].mxu0 }
  0xe9   :  { %v124_v14 = vadd.f32 %v115_v13, %v22_v10 }
  0xea   :  { %127 = vst.msk [vmem:[#allocation2 + $0x8] sm:$0xff] %vm19_vm0, %v125_v12 }
  0xeb   :  { %126 = vst.msk [vmem:[#allocation2] sm:$0xff] %vm19_vm0, %v124_v14 }
  0xf1   :  { %v132_v16 = vld [vmem:[#allocation2 + $0x8] sm:$0xff] }
  0xf2   :  { %v131_v17 = vld [vmem:[#allocation2] sm:$0xff]  ;;  %v141_v18 = vadd.f32 %v166_v15, %v132_v16 }
  0xf3   :  { %v140_v19 = vadd.f32 %v166_v15, %v131_v17 }
  0xf4   :  { %143 = vst.msk [vmem:[#allocation3 + $0x8] sm:$0xff] %vm19_vm0, %v141_v18 }
  0xf5   :  { %142 = vst.msk [vmem:[#allocation3] sm:$0xff] %vm19_vm0, %v140_v19 }
  0xf6   :  { %211 = shalt.err (!%p208_p4)
}
  0xf7   :  { %s212_s28 = scalar_lea.hbm %s294_s3, 256 }
  0xf8   :  { %p213_p5 = scmp.ne.s32.totalorder %s294_s3, %s212_s28  ;;  %p216_p6 = scmp.lt.u32.totalorder %s212_s28, %s294_s3 }
  0xfa   :  { %p218_p7 = pnand %p216_p6, %p213_p5 }
  0xfc   :  { %221 = shalt.err (!%p218_p7)
}
  0xfd   :  { %s226_s6 = smov 128   ;;  %s227_s7 = smov 8  }
  0xfe   :  { %155 = dma.vmem_to_hbm [thread:$0]  %s150_s26, 256, %s294_s3, [#allocation4], %s226_s6, %s226_s6, %s227_s7  }
  0xff   :  { %222 = dma.done.wait [#allocation4], 256  }
 0x100   :  { %223 = vsyncadd [#allocation4], 4294967040 }
 0x101   :  { %159 = vsyncpa [#allocation4], 1 }

</bundles_post_ra>
